<compile_context>
chip_gen: v7x
topology: tpu7x:2x2x1
jax: 0.10.0
libtpu: 0.0.40
codegen_flags: <defaults>
</compile_context>

<pallas_src>
import functools
import math

import jax
import jax.numpy as jnp
from jax import lax
from jax.experimental import pallas as pl
from jax.experimental.pallas import tpu as pltpu


def _latency_kernel(scalar_ref, x_ref, out_ref, *, T, t_block, threshold):
    """One (tile_rows, 128) f32 tile -> (t_block, tile_rows, 128) one-hot spike tile.

    scalar_ref: SMEM (2,) float32 = [global_min, 1/global_range] (prefetched).
    """
    eps = 1e-7
    xmin = scalar_ref[0]
    inv_range = scalar_ref[1]

    x = x_ref[...].astype(jnp.float32)
    xs = (x - xmin) * inv_range                      # global standardization (scalars hoisted)
    data = jnp.maximum(xs, threshold + eps)          # torch.clamp(data, threshold + eps)

    # tau cancels between latency_code_log and the normalize factor:
    #   t = tau*log(d/(d-th)) * (T-1)/(tau*log((th+eps)/eps))
    norm = (T - 1) / math.log((threshold + eps) / eps)
    t_f = jnp.round(norm * jnp.log(data / (data - threshold)))
    t_idx = jnp.clip(t_f, 0.0, float(T - 1)).astype(jnp.int32)   # defensive clip, int compare

    t0 = pl.program_id(1) * t_block                  # first absolute timestep of this T-block

    def write_one(t):
        # One scalar-vs-vreg integer compare + one unmasked lane-dense store per timestep.
        out_ref[t] = (t_idx == (t0 + t)).astype(out_ref.dtype)

    if t_block >= 32:
        def body(t, carry):
            write_one(t)
            return carry
        lax.fori_loop(0, t_block, body, None, unroll=8)
    else:
        for t in range(t_block):
            write_one(t)


def _round_up(x, m):
    return (x + m - 1) // m * m


_SUBLANE = {1: 32, 2: 16, 4: 8}   # output itemsize -> native sublane multiple


def _choose_t_block(T, budget_bytes, lanes, out_bytes, in_bytes, sublane, rows_aligned):
    """Largest divisor of T whose double-buffered output still allows 'good' row tiles."""
    good_rows = min(rows_aligned, 512)
    for tb in sorted((d for d in range(1, T + 1) if T % d == 0), reverse=True):
        max_rows = budget_bytes // (2 * lanes * (tb * out_bytes + in_bytes))
        max_rows = (max_rows // sublane) * sublane
        if max_rows >= good_rows:
            return tb
    return 1


def _choose_tile_rows(rows_aligned, cap, sublane):
    """Largest sublane-multiple divisor of rows_aligned that is <= cap (=> no extra row
    padding, no post-kernel crop). Falls back to `cap` (padding + crop) if the divisors
    are all tiny (awkward factorization)."""
    units = rows_aligned // sublane
    cap_units = max(1, cap // sublane)
    best = 1
    d = 1
    while d * d <= units:
        if units % d == 0:
            for cand in (d, units // d):
                if cand <= cap_units and cand > best:
                    best = cand
        d += 1
    tile_rows = best * sublane
    if tile_rows < min(cap, 256):
        tile_rows = cap
    return tile_rows


def latency_encoder(x, *, T, tau, threshold, lanes=128,
                    vmem_budget_bytes=24 * 1024 * 1024,
                    out_dtype=jnp.bfloat16):
    """JAX wrapper: global min/max in XLA, row-tiled Pallas kernel, reshape back.

    Returns a (T, *x.shape) one-hot spike train. Spikes are exactly 0/1, so the bfloat16
    default is lossless; pass out_dtype=jnp.float32 for exact PyTorch dtype parity.
    """
    del tau  # cancels exactly in the normalized latency formula
    orig_shape = x.shape
    n = x.size

    out_bytes = jnp.dtype(out_dtype).itemsize
    in_bytes = 4
    sublane = max(_SUBLANE.get(out_bytes, 8), 8)

    xf = x.reshape(-1).astype(jnp.float32)
    xmin = jnp.min(xf)
    xmax = jnp.max(xf)
    # Guard constant input (reference would divide by zero -> NaN); no effect otherwise.
    inv_range = 1.0 / jnp.maximum(xmax - xmin, jnp.float32(1e-12))
    scalars = jnp.stack([xmin, inv_range]).astype(jnp.float32)

    rows = pl.cdiv(n, lanes)
    rows_aligned = _round_up(rows, sublane)

    # Time-axis blocking (only kicks in for very large T on small-VMEM parts).
    t_block = _choose_t_block(T, vmem_budget_bytes, lanes, out_bytes, in_bytes,
                              sublane, rows_aligned)
    num_t_blocks = T // t_block

    # Row-tile size: VMEM budget cap + ">=4 grid steps" cap (megacore + writeback overlap).
    budget_rows = vmem_budget_bytes // (2 * lanes * (t_block * out_bytes + in_bytes))
    budget_rows = max(sublane, (budget_rows // sublane) * sublane)
    mc_cap = max(sublane, _round_up(pl.cdiv(rows_aligned, 4), sublane))
    cap = max(sublane, min(budget_rows, mc_cap))
    tile_rows = _choose_tile_rows(rows_aligned, cap, sublane)

    padded_rows = _round_up(rows_aligned, tile_rows)
    padded_n = padded_rows * lanes
    if padded_n != n:
        xf = jnp.pad(xf, (0, padded_n - n))
    x2d = xf.reshape(padded_rows, lanes)

    grid = (padded_rows // tile_rows, num_t_blocks)

    # Double-buffered VMEM actually used by the pipeline, plus slack for compiler scratch.
    vmem_bytes = 2 * tile_rows * lanes * (t_block * out_bytes + in_bytes)
    vmem_limit = max(vmem_bytes + 4 * 1024 * 1024, 8 * 1024 * 1024)

    kernel = functools.partial(_latency_kernel, T=T, t_block=t_block,
                               threshold=float(threshold))

    out = pl.pallas_call(
        kernel,
        out_shape=jax.ShapeDtypeStruct((T, padded_rows, lanes), out_dtype),
        grid_spec=pltpu.PrefetchScalarGridSpec(
            num_scalar_prefetch=1,
            grid=grid,
            in_specs=[pl.BlockSpec((tile_rows, lanes), lambda i, tb, s: (i, 0))],
            out_specs=pl.BlockSpec((t_block, tile_rows, lanes),
                                   lambda i, tb, s: (tb, i, 0)),
        ),
        compiler_params=pltpu.CompilerParams(
            dimension_semantics=("parallel", "arbitrary"),
            vmem_limit_bytes=vmem_limit,
        ),
        cost_estimate=pl.CostEstimate(
            flops=(8 + T) * padded_n,
            transcendentals=num_t_blocks * padded_n,
            bytes_accessed=num_t_blocks * padded_n * in_bytes + T * padded_n * out_bytes,
        ),
    )(scalars, x2d)

    if padded_n != n:
        # Crop only when padding was actually required (non-128/sublane-aligned sizes).
        out = out.reshape(T, padded_n)[:, :n]
    return out.reshape((T,) + orig_shape)


def _latency_reference(x, *, T, tau, threshold):
    """Pure-JAX reference with identical math (tau cancels); used for validation."""
    del tau
    eps = 1e-7
    xf = x.astype(jnp.float32)
    inv_range = 1.0 / jnp.maximum(xf.max() - xf.min(), 1e-12)
    xs = (xf - xf.min()) * inv_range
    data = jnp.maximum(xs, threshold + eps)
    norm = (T - 1) / math.log((threshold + eps) / eps)
    idx = jnp.clip(jnp.round(norm * jnp.log(data / (data - threshold))), 0, T - 1)
    idx = idx.astype(jnp.int32)
    steps = jnp.arange(T, dtype=jnp.int32).reshape((T,) + (1,) * x.ndim)
    return (idx[None] == steps).astype(jnp.float32)


if __name__ == "__main__":
    key = jax.random.PRNGKey(0)
    # small NCHW input consistent with an image-like tensor
    x = jax.random.normal(key, (2, 4, 16, 16), dtype=jnp.float32)

    T, tau, threshold = 8, 5.0, 0.01   # LatencyEncoder(T, tau, threshold)

    spikes = latency_encoder(x, T=T, tau=tau, threshold=threshold)
    spikes = jax.block_until_ready(spikes)

    assert spikes.shape == (T, 2, 4, 16, 16)
    assert spikes.dtype == jnp.bfloat16   # lossless 0/1 spikes; pass out_dtype=float32 for parity

    sf = spikes.astype(jnp.float32)
    # latency coding with normalize=True emits exactly one binary spike per element
    assert bool(jnp.all(jnp.sum(sf, axis=0) == 1.0))
    assert bool(jnp.all((sf == 0.0) | (sf == 1.0)))

    # spike times match the pure-JAX reference (tolerate rare 1-ulp transcendental
    # rounding differences between XLA and Mosaic flipping an index)
    ref = _latency_reference(x, T=T, tau=tau, threshold=threshold)
    idx_k = jnp.argmax(sf, axis=0)
    idx_r = jnp.argmax(ref, axis=0)
    assert float(jnp.mean((idx_k == idx_r).astype(jnp.float32))) > 0.999

    print("KERNEL_OK")
</pallas_src>

<mosaic_0001>
module attributes {stable_mosaic.version = 11 : i64} {
  func.func @_latency_kernel(%arg0: i32, %arg1: i32, %arg2: memref<2xf32, #tpu.memory_space<smem>>, %arg3: memref<16x128xf32, #tpu.memory_space<vmem>>, %arg4: memref<8x16x128xbf16, #tpu.memory_space<vmem>>) attributes {dimension_semantics = [#tpu.dimension_semantics<parallel>, #tpu.dimension_semantics<arbitrary>], iteration_bounds = array<i64: 1, 1>, scalar_prefetch = 1 : i64, scratch_operands = 0 : i64, tpu.core_type = #tpu.core_type<tc>, window_params = [{transform_indices = @transform_0, window_bounds = array<i64: 16, 128>}, {transform_indices = @transform_1, window_bounds = array<i64: 8, 16, 128>}]} {
    %c0 = arith.constant 0 : index
    %0 = memref.load %arg2[%c0] : memref<2xf32, #tpu.memory_space<smem>>
    %c1 = arith.constant 1 : index
    %1 = memref.load %arg2[%c1] : memref<2xf32, #tpu.memory_space<smem>>
    %c0_0 = arith.constant 0 : index
    %c0_1 = arith.constant 0 : index
    %2 = vector.load %arg3[%c0_0, %c0_1] : memref<16x128xf32, #tpu.memory_space<vmem>>, vector<16x128xf32>
    %3 = vector.broadcast %0 : f32 to vector<16x128xf32>
    %4 = arith.subf %2, %3 : vector<16x128xf32>
    %5 = vector.broadcast %1 : f32 to vector<16x128xf32>
    %6 = arith.mulf %4, %5 : vector<16x128xf32>
    %cst = arith.constant 1.000010e-02 : f32
    %7 = vector.broadcast %cst : f32 to vector<16x128xf32>
    %8 = arith.maximumf %6, %7 : vector<16x128xf32>
    %cst_2 = arith.constant 0.00999999977 : f32
    %9 = vector.broadcast %cst_2 : f32 to vector<16x128xf32>
    %10 = arith.subf %8, %9 : vector<16x128xf32>
    %11 = arith.divf %8, %10 : vector<16x128xf32>
    %12 = math.log %11 : vector<16x128xf32>
    %cst_3 = arith.constant 0.608011722 : f32
    %13 = vector.broadcast %cst_3 : f32 to vector<16x128xf32>
    %14 = arith.mulf %13, %12 : vector<16x128xf32>
    %15 = math.roundeven %14 : vector<16x128xf32>
    %cst_4 = arith.constant 0.000000e+00 : f32
    %cst_5 = arith.constant 7.000000e+00 : f32
    %16 = vector.broadcast %cst_4 : f32 to vector<16x128xf32>
    %17 = arith.maximumf %16, %15 : vector<16x128xf32>
    %18 = vector.broadcast %cst_5 : f32 to vector<16x128xf32>
    %19 = arith.minimumf %18, %17 : vector<16x128xf32>
    %20 = arith.fptosi %19 : vector<16x128xf32> to vector<16x128xi32>
    %c8_i32 = arith.constant 8 : i32
    %21 = arith.muli %arg1, %c8_i32 : i32
    %c0_i32 = arith.constant 0 : i32
    %22 = arith.addi %21, %c0_i32 : i32
    %23 = vector.broadcast %22 : i32 to vector<16x128xi32>
    %24 = arith.cmpi eq, %20, %23 : vector<16x128xi32>
    %25 = arith.extui %24 : vector<16x128xi1> to vector<16x128xi32>
    %26 = arith.sitofp %25 : vector<16x128xi32> to vector<16x128xf32>
    %27 = arith.truncf %26 : vector<16x128xf32> to vector<16x128xbf16>
    %c0_6 = arith.constant 0 : index
    %c0_7 = arith.constant 0 : index
    %c0_8 = arith.constant 0 : index
    %28 = vector.load %arg4[%c0_6, %c0_7, %c0_8] : memref<8x16x128xbf16, #tpu.memory_space<vmem>>, vector<1x16x128xbf16>
    %29 = vector.shape_cast %28 : vector<1x16x128xbf16> to vector<16x128xbf16>
    %30 = vector.shape_cast %27 : vector<16x128xbf16> to vector<1x16x128xbf16>
    tpu.vector_store %arg4[%c0_6, %c0_7, %c0_8], %30 {strides = array<i32>} : memref<8x16x128xbf16, #tpu.memory_space<vmem>>, vector<1x16x128xbf16>,
    %c1_i32 = arith.constant 1 : i32
    %31 = arith.addi %21, %c1_i32 : i32
    %32 = vector.broadcast %31 : i32 to vector<16x128xi32>
    %33 = arith.cmpi eq, %20, %32 : vector<16x128xi32>
    %34 = arith.extui %33 : vector<16x128xi1> to vector<16x128xi32>
    %35 = arith.sitofp %34 : vector<16x128xi32> to vector<16x128xf32>
    %36 = arith.truncf %35 : vector<16x128xf32> to vector<16x128xbf16>
    %c1_9 = arith.constant 1 : index
    %c0_10 = arith.constant 0 : index
    %c0_11 = arith.constant 0 : index
    %37 = vector.load %arg4[%c1_9, %c0_10, %c0_11] : memref<8x16x128xbf16, #tpu.memory_space<vmem>>, vector<1x16x128xbf16>
    %38 = vector.shape_cast %37 : vector<1x16x128xbf16> to vector<16x128xbf16>
    %39 = vector.shape_cast %36 : vector<16x128xbf16> to vector<1x16x128xbf16>
    tpu.vector_store %arg4[%c1_9, %c0_10, %c0_11], %39 {strides = array<i32>} : memref<8x16x128xbf16, #tpu.memory_space<vmem>>, vector<1x16x128xbf16>,
    %c2_i32 = arith.constant 2 : i32
    %40 = arith.addi %21, %c2_i32 : i32
    %41 = vector.broadcast %40 : i32 to vector<16x128xi32>
    %42 = arith.cmpi eq, %20, %41 : vector<16x128xi32>
    %43 = arith.extui %42 : vector<16x128xi1> to vector<16x128xi32>
    %44 = arith.sitofp %43 : vector<16x128xi32> to vector<16x128xf32>
    %45 = arith.truncf %44 : vector<16x128xf32> to vector<16x128xbf16>
    %c2 = arith.constant 2 : index
    %c0_12 = arith.constant 0 : index
    %c0_13 = arith.constant 0 : index
    %46 = vector.load %arg4[%c2, %c0_12, %c0_13] : memref<8x16x128xbf16, #tpu.memory_space<vmem>>, vector<1x16x128xbf16>
    %47 = vector.shape_cast %46 : vector<1x16x128xbf16> to vector<16x128xbf16>
    %48 = vector.shape_cast %45 : vector<16x128xbf16> to vector<1x16x128xbf16>
    tpu.vector_store %arg4[%c2, %c0_12, %c0_13], %48 {strides = array<i32>} : memref<8x16x128xbf16, #tpu.memory_space<vmem>>, vector<1x16x128xbf16>,
    %c3_i32 = arith.constant 3 : i32
    %49 = arith.addi %21, %c3_i32 : i32
    %50 = vector.broadcast %49 : i32 to vector<16x128xi32>
    %51 = arith.cmpi eq, %20, %50 : vector<16x128xi32>
    %52 = arith.extui %51 : vector<16x128xi1> to vector<16x128xi32>
    %53 = arith.sitofp %52 : vector<16x128xi32> to vector<16x128xf32>
    %54 = arith.truncf %53 : vector<16x128xf32> to vector<16x128xbf16>
    %c3 = arith.constant 3 : index
    %c0_14 = arith.constant 0 : index
    %c0_15 = arith.constant 0 : index
    %55 = vector.load %arg4[%c3, %c0_14, %c0_15] : memref<8x16x128xbf16, #tpu.memory_space<vmem>>, vector<1x16x128xbf16>
    %56 = vector.shape_cast %55 : vector<1x16x128xbf16> to vector<16x128xbf16>
    %57 = vector.shape_cast %54 : vector<16x128xbf16> to vector<1x16x128xbf16>
    tpu.vector_store %arg4[%c3, %c0_14, %c0_15], %57 {strides = array<i32>} : memref<8x16x128xbf16, #tpu.memory_space<vmem>>, vector<1x16x128xbf16>,
    %c4_i32 = arith.constant 4 : i32
    %58 = arith.addi %21, %c4_i32 : i32
    %59 = vector.broadcast %58 : i32 to vector<16x128xi32>
    %60 = arith.cmpi eq, %20, %59 : vector<16x128xi32>
    %61 = arith.extui %60 : vector<16x128xi1> to vector<16x128xi32>
    %62 = arith.sitofp %61 : vector<16x128xi32> to vector<16x128xf32>
    %63 = arith.truncf %62 : vector<16x128xf32> to vector<16x128xbf16>
    %c4 = arith.constant 4 : index
    %c0_16 = arith.constant 0 : index
    %c0_17 = arith.constant 0 : index
    %64 = vector.load %arg4[%c4, %c0_16, %c0_17] : memref<8x16x128xbf16, #tpu.memory_space<vmem>>, vector<1x16x128xbf16>
    %65 = vector.shape_cast %64 : vector<1x16x128xbf16> to vector<16x128xbf16>
    %66 = vector.shape_cast %63 : vector<16x128xbf16> to vector<1x16x128xbf16>
    tpu.vector_store %arg4[%c4, %c0_16, %c0_17], %66 {strides = array<i32>} : memref<8x16x128xbf16, #tpu.memory_space<vmem>>, vector<1x16x128xbf16>,
    %c5_i32 = arith.constant 5 : i32
    %67 = arith.addi %21, %c5_i32 : i32
    %68 = vector.broadcast %67 : i32 to vector<16x128xi32>
    %69 = arith.cmpi eq, %20, %68 : vector<16x128xi32>
    %70 = arith.extui %69 : vector<16x128xi1> to vector<16x128xi32>
    %71 = arith.sitofp %70 : vector<16x128xi32> to vector<16x128xf32>
    %72 = arith.truncf %71 : vector<16x128xf32> to vector<16x128xbf16>
    %c5 = arith.constant 5 : index
    %c0_18 = arith.constant 0 : index
    %c0_19 = arith.constant 0 : index
    %73 = vector.load %arg4[%c5, %c0_18, %c0_19] : memref<8x16x128xbf16, #tpu.memory_space<vmem>>, vector<1x16x128xbf16>
    %74 = vector.shape_cast %73 : vector<1x16x128xbf16> to vector<16x128xbf16>
    %75 = vector.shape_cast %72 : vector<16x128xbf16> to vector<1x16x128xbf16>
    tpu.vector_store %arg4[%c5, %c0_18, %c0_19], %75 {strides = array<i32>} : memref<8x16x128xbf16, #tpu.memory_space<vmem>>, vector<1x16x128xbf16>,
    %c6_i32 = arith.constant 6 : i32
    %76 = arith.addi %21, %c6_i32 : i32
    %77 = vector.broadcast %76 : i32 to vector<16x128xi32>
    %78 = arith.cmpi eq, %20, %77 : vector<16x128xi32>
    %79 = arith.extui %78 : vector<16x128xi1> to vector<16x128xi32>
    %80 = arith.sitofp %79 : vector<16x128xi32> to vector<16x128xf32>
    %81 = arith.truncf %80 : vector<16x128xf32> to vector<16x128xbf16>
    %c6 = arith.constant 6 : index
    %c0_20 = arith.constant 0 : index
    %c0_21 = arith.constant 0 : index
    %82 = vector.load %arg4[%c6, %c0_20, %c0_21] : memref<8x16x128xbf16, #tpu.memory_space<vmem>>, vector<1x16x128xbf16>
    %83 = vector.shape_cast %82 : vector<1x16x128xbf16> to vector<16x128xbf16>
    %84 = vector.shape_cast %81 : vector<16x128xbf16> to vector<1x16x128xbf16>
    tpu.vector_store %arg4[%c6, %c0_20, %c0_21], %84 {strides = array<i32>} : memref<8x16x128xbf16, #tpu.memory_space<vmem>>, vector<1x16x128xbf16>,
    %c7_i32 = arith.constant 7 : i32
    %85 = arith.addi %21, %c7_i32 : i32
    %86 = vector.broadcast %85 : i32 to vector<16x128xi32>
    %87 = arith.cmpi eq, %20, %86 : vector<16x128xi32>
    %88 = arith.extui %87 : vector<16x128xi1> to vector<16x128xi32>
    %89 = arith.sitofp %88 : vector<16x128xi32> to vector<16x128xf32>
    %90 = arith.truncf %89 : vector<16x128xf32> to vector<16x128xbf16>
    %c7 = arith.constant 7 : index
    %c0_22 = arith.constant 0 : index
    %c0_23 = arith.constant 0 : index
    %91 = vector.load %arg4[%c7, %c0_22, %c0_23] : memref<8x16x128xbf16, #tpu.memory_space<vmem>>, vector<1x16x128xbf16>
    %92 = vector.shape_cast %91 : vector<1x16x128xbf16> to vector<16x128xbf16>
    %93 = vector.shape_cast %90 : vector<16x128xbf16> to vector<1x16x128xbf16>
    tpu.vector_store %arg4[%c7, %c0_22, %c0_23], %93 {strides = array<i32>} : memref<8x16x128xbf16, #tpu.memory_space<vmem>>, vector<1x16x128xbf16>,
    return
  }
  func.func @transform_0(%arg0: i32, %arg1: i32, %arg2: memref<2xf32, #tpu.memory_space<smem>>) -> (i32, i32) {
    %c0_i32 = arith.constant 0 : i32
    %c0_i32_0 = arith.constant 0 : i32
    return %arg0, %c0_i32 : i32, i32
  }
  func.func @transform_1(%arg0: i32, %arg1: i32, %arg2: memref<2xf32, #tpu.memory_space<smem>>) -> (i32, i32, i32) {
    %c0_i32 = arith.constant 0 : i32
    %c0_i32_0 = arith.constant 0 : i32
    return %arg1, %arg0, %c0_i32 : i32, i32, i32
  }
}

</mosaic_0001>

<bundles_post_ra>
// kernel: tpu_custom_call.1
= control target key start
LH: loop header
LB: loop body
LE: loop exit
PB: predicated region body
PF: predicated region fallthrough
CT: control target
= control target key end

     0   :  { %s450_s0 = inlined_call_operand.hbm [shape: f32[2], index: 0, kind: input, shape index: {}]   ;;  %s451_s1 = inlined_call_operand.hbm [shape: f32[16,128], index: 1, kind: input, shape index: {}]   ;;  %s452_s2 = inlined_call_operand.hbm [shape: bf16[8,16,128], index: 2, kind: output, shape index: {}]  }
   0x1   :  { %s331_s11 = scalar_lea.hbm %s450_s0, 16 }
   0x2   :  { %p332_p0 = scmp.ne.s32.totalorder %s450_s0, %s331_s11  ;;  %p335_p1 = scmp.lt.u32.totalorder %s331_s11, %s450_s0 }
   0x4   :  { %p337_p2 = pnand %p335_p1, %p332_p0 }
   0x6   :  { %340 = shalt.err (!%p337_p2)  }
   0x7   :  { %s391_s16 = smov [#allocation3]  }
   0x8   :  { %8 = dma.hbm_to_smem %s450_s0, 16, %s391_s16, [#allocation2] }
   0x9   :  { %385 = dma.done.wait [#allocation2], 16 }
   0xa   :  { %386 = vsyncadd [#allocation2], 4294967280 }
   0xb   :  { %10 = sfence }
   0xc   :  { %11 = vsyncpa [#allocation5], 0 }
   0xd   :  { %12 = vsyncpa [#allocation6], 0  ;;  %s392_s19 = smov [#allocation4]   ;;  %s341_s23 = scalar_lea.hbm %s451_s1, 256 }
   0xe   :  { %s18_s20 = sshll.u32 %s392_s19, 4  ;;  %p342_p3 = scmp.ne.s32.totalorder %s451_s1, %s341_s23  ;;  %s19_s20 = int_to_ptr.vmem [resolvable:$true] %s18_s20 }
   0xf   :  { %p345_p4 = scmp.lt.u32.totalorder %s341_s23, %s451_s1 }
  0x11   :  { %p347_p5 = pnand %p345_p4, %p342_p3 }
  0x13   :  { %350 = shalt.err (!%p347_p5)
}
  0x14   :  { %s351_s0 = scalar_lea.vmem %s19_s20, 256  ;;  %p356_p7 = scmp.lt.s32.totalorder %s19_s20, %s19_s20 }
  0x15   :  { %p352_p6 = scmp.ne.s32.totalorder %s19_s20, %s351_s0  ;;  %p357_p8 = scmp.lt.s32.totalorder %s351_s0, %s351_s0 }
  0x17   :  { %p358_p9 = por %p357_p8, %p356_p7 }
  0x19   :  { %p359_p10 = pnand %p358_p9, %p352_p6 }
  0x1b   :  { %362 = shalt.err (!%p359_p10)
}
  0x1c   :  { %s393_s28 = smov 128   ;;  %s394_s29 = smov 8  }
  0x1d   :  { %24 = dma.hbm_to_vmem [thread:$0]  %s451_s1, 256, %s19_s20, [#allocation5], %s393_s28, %s393_s28, %s394_s29  }
  0x1e   :  { %387 = dma.done.wait [#allocation5], 256  }
  0x1f   :  { %388 = vsyncadd [#allocation5], 4294967040  ;;  %s28_s4 = sld [smem:[#allocation3]]  ;;  %s228_s5 = sld [smem:[#allocation3 + $0x1]]  ;;  %v30_v0 = vld [vmem:[#allocation4] sm:$0xff]  ;;  %v31_v1 = vld [vmem:[#allocation4 + $0x8] sm:$0xff] }
  0x20   :  { %v395_v28 = vmov 0.0   ;;  %s396_s1 = smov [#allocation7]  }
  0x21   :  { %s216_s6 = sshll.u32 %s396_s1, 4  ;;  %s217_s6 = int_to_ptr.vmem [resolvable:$true] %s216_s6 }
  0x22   :  { %s363_s7 = scalar_lea.vmem %s217_s6, 1024  ;;  %p368_p12 = scmp.lt.s32.totalorder %s217_s6, %s217_s6 }
  0x23   :  { %p364_p11 = scmp.ne.s32.totalorder %s217_s6, %s363_s7  ;;  %p369_p13 = scmp.lt.s32.totalorder %s363_s7, %s363_s7 }
  0x25   :  { %v32_v2 = vstv %s28_s4  ;;  %v35_v3 = vstv %s228_s5  ;;  %p370_p0 = por %p369_p13, %p368_p12 }
  0x26   :  { %v33_v4 = vsub.f32 %v30_v0, %v32_v2  ;;  %v34_v5 = vsub.f32 %v31_v1, %v32_v2 }
  0x27   :  { %p371_p1 = pnand %p370_p0, %p364_p11 }
  0x28   :  { %v36_v6 = vmul.f32 %v35_v3, %v33_v4  ;;  %v37_v7 = vmul.f32 %v35_v3, %v34_v5 }
  0x2a   :  { %v38_v8 = vmax.f32 %v36_v6, 0.0100001  ;;  %v39_v9 = vmax.f32 %v37_v7, 0.0100001 }
  0x2c   :  { %v229_v10 = vadd.f32 -0.01, %v38_v8  ;;  %v230_v11 = vadd.f32 -0.01, %v39_v9 }
  0x2e   :  { %323 = vrcp.f32 %v229_v10 }
  0x2f   :  { %325 = vrcp.f32 %v230_v11 }
  0x38   :  { %v324_v12 = vpop.eup %323 }
  0x39   :  { %v326_v13 = vpop.eup %325  ;;  %v43_v14 = vmul.f32 %v324_v12, %v38_v8 }
  0x3a   :  { %v45_v15 = vmul.f32 %v326_v13, %v39_v9 }
  0x3b   :  { %327 = vlog2.f32 %v43_v14 }
  0x3c   :  { %329 = vlog2.f32 %v45_v15 }
  0x45   :  { %v328_v16 = vpop.eup %327 }
  0x46   :  { %v330_v17 = vpop.eup %329  ;;  %v47_v18 = vmul.f32 0.6931472, %v328_v16 }
  0x47   :  { %v49_v19 = vmul.f32 0.6931472, %v330_v17 }
  0x48   :  { %v50_v20 = vmul.f32 0.6080117, %v47_v18 }
  0x49   :  { %v51_v21 = vmul.f32 0.6080117, %v49_v19 }
  0x4a   :  { %v231_v22 = vmax.f32 %v50_v20, 0.0 }
  0x4b   :  { %v234_v23 = vmax.f32 %v51_v21, 0.0 }
  0x4c   :  { %v232_v24 = vmin.f32 %v231_v22, 7.0 }
  0x4d   :  { %v235_v25 = vmin.f32 %v234_v23, 7.0 }
  0x4e   :  { %v311_v26 = vcvt.f32.s32 %v232_v24 }
  0x4f   :  { %v314_v27 = vcvt.f32.s32 %v235_v25 }
  0x50   :  { %vm62_vm0 = vcmp.eq.s32.totalorder %v311_v26, 0  ;;  %vm80_vm1 = vcmp.eq.s32.totalorder %v311_v26, 1  ;;  %vm99_vm2 = vcmp.eq.s32.totalorder %v311_v26, 2  ;;  %vm118_vm3 = vcmp.eq.s32.totalorder %v311_v26, 3 }
  0x51   :  { %vm63_vm4 = vcmp.eq.s32.totalorder %v314_v27, 0  ;;  %v237_v29 = vsel %vm62_vm0, 1.0, %v395_v28  ;;  %vm81_vm5 = vcmp.eq.s32.totalorder %v314_v27, 1  ;;  %v241_v30 = vsel %vm80_vm1, 1.0, %v395_v28 }
  0x52   :  { %v238_v31 = vsel %vm63_vm4, 1.0, %v395_v28  ;;  %v242_v32 = vsel %vm81_vm5, 1.0, %v395_v28  ;;  %vm100_vm6 = vcmp.eq.s32.totalorder %v314_v27, 2  ;;  %v245_v33 = vsel %vm99_vm2, 1.0, %v395_v28 }
  0x53   :  { %v286_v34 = vpack.c.bf16 %v238_v31, %v237_v29  ;;  %v289_v35 = vpack.c.bf16 %v242_v32, %v241_v30  ;;  %v246_v36 = vsel %vm100_vm6, 1.0, %v395_v28  ;;  %vm119_vm7 = vcmp.eq.s32.totalorder %v314_v27, 3 }
  0x54   :  { %v292_v37 = vpack.c.bf16 %v246_v36, %v245_v33  ;;  %v249_v38 = vsel %vm118_vm3, 1.0, %v395_v28  ;;  %v250_v39 = vsel %vm119_vm7, 1.0, %v395_v28  ;;  %vm137_vm8 = vcmp.eq.s32.totalorder %v311_v26, 4 }
  0x55   :  { %287 = vst [vmem:[#allocation7] sm:$0xff] %v286_v34   ;;  %290 = vst [vmem:[#allocation7 + $0x8] sm:$0xff] %v289_v35   ;;  %v295_v40 = vpack.c.bf16 %v250_v39, %v249_v38  ;;  %vm138_vm9 = vcmp.eq.s32.totalorder %v314_v27, 4  ;;  %v253_v41 = vsel %vm137_vm8, 1.0, %v395_v28  ;;  %vm156_vm10 = vcmp.eq.s32.totalorder %v311_v26, 5 }
  0x56   :  { %293 = vst [vmem:[#allocation7 + $0x10] sm:$0xff] %v292_v37   ;;  %v254_v42 = vsel %vm138_vm9, 1.0, %v395_v28  ;;  %vm157_vm11 = vcmp.eq.s32.totalorder %v314_v27, 5  ;;  %v257_v43 = vsel %vm156_vm10, 1.0, %v395_v28  ;;  %vm175_vm12 = vcmp.eq.s32.totalorder %v311_v26, 6 }
  0x57   :  { %296 = vst [vmem:[#allocation7 + $0x18] sm:$0xff] %v295_v40   ;;  %v298_v44 = vpack.c.bf16 %v254_v42, %v253_v41  ;;  %v258_v45 = vsel %vm157_vm11, 1.0, %v395_v28  ;;  %vm176_vm13 = vcmp.eq.s32.totalorder %v314_v27, 6  ;;  %v261_v46 = vsel %vm175_vm12, 1.0, %v395_v28 }
  0x58   :  { %v301_v47 = vpack.c.bf16 %v258_v45, %v257_v43  ;;  %v262_v48 = vsel %vm176_vm13, 1.0, %v395_v28  ;;  %vm194_vm14 = vcmp.eq.s32.totalorder %v311_v26, 7  ;;  %vm195_vm15 = vcmp.eq.s32.totalorder %v314_v27, 7 }
  0x59   :  { %299 = vst [vmem:[#allocation7 + $0x20] sm:$0xff] %v298_v44   ;;  %v304_v49 = vpack.c.bf16 %v262_v48, %v261_v46  ;;  %v265_v50 = vsel %vm194_vm14, 1.0, %v395_v28  ;;  %v266_v51 = vsel %vm195_vm15, 1.0, %v395_v28 }
  0x5a   :  { %302 = vst [vmem:[#allocation7 + $0x28] sm:$0xff] %v301_v47   ;;  %v307_v52 = vpack.c.bf16 %v266_v51, %v265_v50 }
  0x5b   :  { %305 = vst [vmem:[#allocation7 + $0x30] sm:$0xff] %v304_v49  }
  0x5c   :  { %308 = vst [vmem:[#allocation7 + $0x38] sm:$0xff] %v307_v52  }
  0x5d   :  { %374 = shalt.err (!%p371_p1)
}
  0x5e   :  { %s375_s10 = scalar_lea.hbm %s452_s2, 1024 }
  0x5f   :  { %p376_p2 = scmp.ne.s32.totalorder %s452_s2, %s375_s10  ;;  %p379_p3 = scmp.lt.u32.totalorder %s375_s10, %s452_s2 }
  0x61   :  { %p381_p4 = pnand %p379_p3, %p376_p2 }
  0x63   :  { %384 = shalt.err (!%p381_p4)
}
  0x64   :  { %s397_s15 = smov 64   ;;  %s398_s16 = smov 4  }
  0x65   :  { %222 = dma.vmem_to_hbm [thread:$0]  %s217_s6, 1024, %s452_s2, [#allocation6], %s397_s15, %s397_s15, %s398_s16  }
  0x66   :  { %389 = dma.done.wait [#allocation6], 1024  }
  0x67   :  { %390 = vsyncadd [#allocation6], 4294966272 }
  0x68   :  { %226 = vsyncpa [#allocation5], 1 }
  0x69   :  { %227 = vsyncpa [#allocation6], 1 }

</bundles_post_ra>
